<compile_context>
chip_gen: v7x
topology: tpu7x:2x2x1
jax: 0.10.0
libtpu: 0.0.40
codegen_flags: <defaults>
</compile_context>

<pallas_src>
import functools

import jax
import jax.numpy as jnp
from jax.experimental import pallas as pl
from jax.experimental.pallas import tpu as pltpu


def _round_up(x, m):
    return (x + m - 1) // m * m


def actor_kernel(obs_ref,                      # VMEM (TB, F)  f32
                 w1_ref, b1_ref,               # VMEM (F, H) bf16, (1, H) f32
                 w2_ref, b2_ref,               # VMEM (H, H) bf16, (1, H) f32
                 w3_ref, b3_ref,               # VMEM (H, A_pad) bf16, (1, A_pad) f32
                 mu_ref):                      # VMEM (TB, A_pad) f32
    # Layer 1: bf16 MXU matmul, f32 accumulate, f32 bias + ReLU.
    x = obs_ref[...].astype(jnp.bfloat16)
    h1 = jnp.dot(x, w1_ref[...], preferred_element_type=jnp.float32) + b1_ref[...]
    h1 = jnp.maximum(h1, 0.0)

    # Layer 2.
    h2 = jnp.dot(h1.astype(jnp.bfloat16), w2_ref[...],
                 preferred_element_type=jnp.float32) + b2_ref[...]
    h2 = jnp.maximum(h2, 0.0)

    # Layer 3 + tanh (padded action lanes carry zeros -> tanh(0)=0, discarded).
    mu = jnp.dot(h2.astype(jnp.bfloat16), w3_ref[...],
                 preferred_element_type=jnp.float32) + b3_ref[...]
    mu_ref[...] = jnp.tanh(mu)


@functools.partial(jax.jit, static_argnames=("block_b",))
def actor_forward(obs, params, std, *, block_b=256):
    """Run the Actor MLP with a batch-tiled Pallas kernel.

    obs: (B, F) f32.  params: (w1 bf16 (F,H), b1 f32 (1,H), w2 bf16 (H,H),
    b2 f32 (1,H), w3 bf16 (H,A), b3 f32 (1,A)).  std: scalar.
    Returns (mu (B, A) f32, std (B, A) f32).
    """
    w1, b1, w2, b2, w3, b3 = params
    B, F = obs.shape
    H = w1.shape[1]
    A = w3.shape[1]

    # Lane-dense output slab: pad action dim to a multiple of 128.
    A_pad = _round_up(A, 128)
    w3p = jnp.zeros((H, A_pad), w3.dtype).at[:, :A].set(w3)
    b3p = jnp.zeros((1, A_pad), b3.dtype).at[:, :A].set(b3)

    # Batch tile: multiple of 8 (sublane), capped at block_b; pad B up to it.
    TB = min(block_b, _round_up(B, 8))
    B_pad = _round_up(B, TB)
    if B_pad != B:
        obs_p = jnp.zeros((B_pad, F), obs.dtype).at[:B].set(obs)
    else:
        obs_p = obs

    grid = (B_pad // TB,)

    flops = 2 * B_pad * (F * H + H * H + H * A_pad)
    bytes_accessed = (obs_p.size * 4
                      + (w1.size + w2.size + w3p.size) * 2
                      + (b1.size + b2.size + b3p.size) * 4
                      + B_pad * A_pad * 4)

    mu_padded = pl.pallas_call(
        actor_kernel,
        out_shape=jax.ShapeDtypeStruct((B_pad, A_pad), jnp.float32),
        grid=grid,
        in_specs=[
            pl.BlockSpec((TB, F), lambda i: (i, 0)),        # obs tile (pipelined)
            pl.BlockSpec((F, H), lambda i: (0, 0)),         # w1 (resident)
            pl.BlockSpec((1, H), lambda i: (0, 0)),         # b1
            pl.BlockSpec((H, H), lambda i: (0, 0)),         # w2
            pl.BlockSpec((1, H), lambda i: (0, 0)),         # b2
            pl.BlockSpec((H, A_pad), lambda i: (0, 0)),     # w3 (padded)
            pl.BlockSpec((1, A_pad), lambda i: (0, 0)),     # b3 (padded)
        ],
        out_specs=pl.BlockSpec((TB, A_pad), lambda i: (i, 0)),
        compiler_params=pltpu.CompilerParams(
            dimension_semantics=("parallel",),              # megacore split on v7x
            vmem_limit_bytes=64 * 1024 * 1024,
        ),
        cost_estimate=pl.CostEstimate(
            flops=flops,
            transcendentals=B_pad * A_pad,                  # tanh
            bytes_accessed=bytes_accessed,
        ),
    )(obs_p, w1, b1, w2, b2, w3p, b3p)

    mu = mu_padded[:B, :A]
    # std = torch.ones_like(mu) * std — constant broadcast, done outside kernel.
    std_out = jnp.full((B, A), std, jnp.float32)
    return mu, std_out


def init_actor_params(key, feature_dim, hidden_dim, action_dim):
    """Deterministic synthetic init (stand-in for utils.weight_init).

    Weights stored bf16 (MXU-native on v6e/v7x), biases f32.
    """
    k1, k2, k3 = jax.random.split(key, 3)

    def lin(k, fan_in, fan_out):
        w = (jax.random.normal(k, (fan_in, fan_out), jnp.float32)
             / jnp.sqrt(fan_in)).astype(jnp.bfloat16)
        b = jnp.zeros((1, fan_out), jnp.float32)
        return w, b

    w1, b1 = lin(k1, feature_dim, hidden_dim)
    w2, b2 = lin(k2, hidden_dim, hidden_dim)
    w3, b3 = lin(k3, hidden_dim, action_dim)
    return (w1, b1, w2, b2, w3, b3)


def actor_ref(obs, params, std):
    """Pure-JAX reference mirroring the kernel's bf16-matmul / f32-accum math."""
    w1, b1, w2, b2, w3, b3 = params
    h1 = jnp.maximum(
        jnp.dot(obs.astype(jnp.bfloat16), w1,
                preferred_element_type=jnp.float32) + b1, 0.0)
    h2 = jnp.maximum(
        jnp.dot(h1.astype(jnp.bfloat16), w2,
                preferred_element_type=jnp.float32) + b2, 0.0)
    mu = jnp.tanh(
        jnp.dot(h2.astype(jnp.bfloat16), w3,
                preferred_element_type=jnp.float32) + b3)
    return mu, jnp.full_like(mu, std)


if __name__ == "__main__":
    # Small shapes consistent with the module's forward.
    B, FEATURE_DIM, HIDDEN_DIM, ACTION_DIM = 256, 64, 256, 6
    STD = 0.2

    key = jax.random.PRNGKey(0)
    k_obs, k_params = jax.random.split(key)

    obs = jax.random.normal(k_obs, (B, FEATURE_DIM), jnp.float32)
    params = init_actor_params(k_params, FEATURE_DIM, HIDDEN_DIM, ACTION_DIM)

    mu, std_out = actor_forward(obs, params, STD, block_b=128)
    jax.block_until_ready((mu, std_out))

    mu_ref, std_ref = actor_ref(obs, params, STD)
    assert mu.shape == (B, ACTION_DIM) and std_out.shape == (B, ACTION_DIM)
    assert jnp.allclose(mu, mu_ref, atol=1e-2, rtol=1e-2), "mu mismatch"
    assert jnp.allclose(std_out, std_ref, atol=1e-6), "std mismatch"

    # TODO(synk): TruncatedNormal distribution object (sampling/log_prob) has no
    # Pallas equivalent here; the wrapper returns its (mu, std) parameters.
    print("KERNEL_OK")
</pallas_src>

<mosaic_0001>
module attributes {stable_mosaic.version = 11 : i64} {
  func.func @actor_kernel(%arg0: i32, %arg1: memref<128x64xf32, #tpu.memory_space<vmem>>, %arg2: memref<64x256xbf16, #tpu.memory_space<vmem>>, %arg3: memref<1x256xf32, #tpu.memory_space<vmem>>, %arg4: memref<256x256xbf16, #tpu.memory_space<vmem>>, %arg5: memref<1x256xf32, #tpu.memory_space<vmem>>, %arg6: memref<256x128xbf16, #tpu.memory_space<vmem>>, %arg7: memref<1x128xf32, #tpu.memory_space<vmem>>, %arg8: memref<128x128xf32, #tpu.memory_space<vmem>>) attributes {dimension_semantics = [#tpu.dimension_semantics<parallel>], iteration_bounds = array<i64: 2>, scalar_prefetch = 0 : i64, scratch_operands = 0 : i64, tpu.core_type = #tpu.core_type<tc>, window_params = [{transform_indices = @transform_0, window_bounds = array<i64: 128, 64>}, {pipeline_mode = #tpu.pipeline_mode<synchronous>, transform_indices = @transform_1, window_bounds = array<i64: 64, 256>}, {pipeline_mode = #tpu.pipeline_mode<synchronous>, transform_indices = @transform_2, window_bounds = array<i64: 1, 256>}, {pipeline_mode = #tpu.pipeline_mode<synchronous>, transform_indices = @transform_3, window_bounds = array<i64: 256, 256>}, {pipeline_mode = #tpu.pipeline_mode<synchronous>, transform_indices = @transform_4, window_bounds = array<i64: 1, 256>}, {pipeline_mode = #tpu.pipeline_mode<synchronous>, transform_indices = @transform_5, window_bounds = array<i64: 256, 128>}, {pipeline_mode = #tpu.pipeline_mode<synchronous>, transform_indices = @transform_6, window_bounds = array<i64: 1, 128>}, {transform_indices = @transform_7, window_bounds = array<i64: 128, 128>}]} {
    %c0 = arith.constant 0 : index
    %c0_0 = arith.constant 0 : index
    %0 = vector.load %arg1[%c0, %c0_0] : memref<128x64xf32, #tpu.memory_space<vmem>>, vector<128x64xf32>
    %1 = arith.truncf %0 : vector<128x64xf32> to vector<128x64xbf16>
    %c0_1 = arith.constant 0 : index
    %c0_2 = arith.constant 0 : index
    %2 = vector.load %arg2[%c0_1, %c0_2] : memref<64x256xbf16, #tpu.memory_space<vmem>>, vector<64x256xbf16>
    %cst = arith.constant dense<0.000000e+00> : vector<128x256xf32>
    %3 = tpu.matmul %1, %2, %cst {dimension_numbers = #tpu.dot_dimension_numbers<[1], [0], [0], [1], [0, 0, 1, 1], [], []>} : vector<128x64xbf16>, vector<64x256xbf16>, vector<128x256xf32> -> vector<128x256xf32>
    %c0_3 = arith.constant 0 : index
    %c0_4 = arith.constant 0 : index
    %4 = vector.load %arg3[%c0_3, %c0_4] : memref<1x256xf32, #tpu.memory_space<vmem>>, vector<1x256xf32>
    %5 = vector.broadcast %4 : vector<1x256xf32> to vector<128x256xf32>
    %6 = arith.addf %3, %5 : vector<128x256xf32>
    %cst_5 = arith.constant 0.000000e+00 : f32
    %7 = vector.broadcast %cst_5 : f32 to vector<128x256xf32>
    %8 = arith.maximumf %6, %7 : vector<128x256xf32>
    %9 = arith.truncf %8 : vector<128x256xf32> to vector<128x256xbf16>
    %c0_6 = arith.constant 0 : index
    %c0_7 = arith.constant 0 : index
    %10 = vector.load %arg4[%c0_6, %c0_7] : memref<256x256xbf16, #tpu.memory_space<vmem>>, vector<256x256xbf16>
    %cst_8 = arith.constant dense<0.000000e+00> : vector<128x256xf32>
    %11 = tpu.matmul %9, %10, %cst_8 {dimension_numbers = #tpu.dot_dimension_numbers<[1], [0], [0], [1], [0, 0, 1, 1], [], []>} : vector<128x256xbf16>, vector<256x256xbf16>, vector<128x256xf32> -> vector<128x256xf32>
    %c0_9 = arith.constant 0 : index
    %c0_10 = arith.constant 0 : index
    %12 = vector.load %arg5[%c0_9, %c0_10] : memref<1x256xf32, #tpu.memory_space<vmem>>, vector<1x256xf32>
    %13 = vector.broadcast %12 : vector<1x256xf32> to vector<128x256xf32>
    %14 = arith.addf %11, %13 : vector<128x256xf32>
    %cst_11 = arith.constant 0.000000e+00 : f32
    %15 = vector.broadcast %cst_11 : f32 to vector<128x256xf32>
    %16 = arith.maximumf %14, %15 : vector<128x256xf32>
    %17 = arith.truncf %16 : vector<128x256xf32> to vector<128x256xbf16>
    %c0_12 = arith.constant 0 : index
    %c0_13 = arith.constant 0 : index
    %18 = vector.load %arg6[%c0_12, %c0_13] : memref<256x128xbf16, #tpu.memory_space<vmem>>, vector<256x128xbf16>
    %cst_14 = arith.constant dense<0.000000e+00> : vector<128x128xf32>
    %19 = tpu.matmul %17, %18, %cst_14 {dimension_numbers = #tpu.dot_dimension_numbers<[1], [0], [0], [1], [0, 0, 1, 1], [], []>} : vector<128x256xbf16>, vector<256x128xbf16>, vector<128x128xf32> -> vector<128x128xf32>
    %c0_15 = arith.constant 0 : index
    %c0_16 = arith.constant 0 : index
    %20 = vector.load %arg7[%c0_15, %c0_16] : memref<1x128xf32, #tpu.memory_space<vmem>>, vector<1x128xf32>
    %21 = vector.broadcast %20 : vector<1x128xf32> to vector<128x128xf32>
    %22 = arith.addf %19, %21 : vector<128x128xf32>
    %23 = math.tanh %22 : vector<128x128xf32>
    %c0_17 = arith.constant 0 : index
    %c0_18 = arith.constant 0 : index
    %24 = vector.load %arg8[%c0_17, %c0_18] : memref<128x128xf32, #tpu.memory_space<vmem>>, vector<128x128xf32>
    tpu.vector_store %arg8[%c0_17, %c0_18], %23 {strides = array<i32>} : memref<128x128xf32, #tpu.memory_space<vmem>>, vector<128x128xf32>,
    return
  }
  func.func @transform_0(%arg0: i32) -> (i32, i32) {
    %c0_i32 = arith.constant 0 : i32
    %c0_i32_0 = arith.constant 0 : i32
    return %arg0, %c0_i32 : i32, i32
  }
  func.func @transform_1(%arg0: i32) -> (i32, i32) {
    %c0_i32 = arith.constant 0 : i32
    %c0_i32_0 = arith.constant 0 : i32
    %c0_i32_1 = arith.constant 0 : i32
    return %c0_i32, %c0_i32_0 : i32, i32
  }
  func.func @transform_2(%arg0: i32) -> (i32, i32) {
    %c0_i32 = arith.constant 0 : i32
    %c0_i32_0 = arith.constant 0 : i32
    %c0_i32_1 = arith.constant 0 : i32
    return %c0_i32, %c0_i32_0 : i32, i32
  }
  func.func @transform_3(%arg0: i32) -> (i32, i32) {
    %c0_i32 = arith.constant 0 : i32
    %c0_i32_0 = arith.constant 0 : i32
    %c0_i32_1 = arith.constant 0 : i32
    return %c0_i32, %c0_i32_0 : i32, i32
  }
  func.func @transform_4(%arg0: i32) -> (i32, i32) {
    %c0_i32 = arith.constant 0 : i32
    %c0_i32_0 = arith.constant 0 : i32
    %c0_i32_1 = arith.constant 0 : i32
    return %c0_i32, %c0_i32_0 : i32, i32
  }
  func.func @transform_5(%arg0: i32) -> (i32, i32) {
    %c0_i32 = arith.constant 0 : i32
    %c0_i32_0 = arith.constant 0 : i32
    %c0_i32_1 = arith.constant 0 : i32
    return %c0_i32, %c0_i32_0 : i32, i32
  }
  func.func @transform_6(%arg0: i32) -> (i32, i32) {
    %c0_i32 = arith.constant 0 : i32
    %c0_i32_0 = arith.constant 0 : i32
    %c0_i32_1 = arith.constant 0 : i32
    return %c0_i32, %c0_i32_0 : i32, i32
  }
  func.func @transform_7(%arg0: i32) -> (i32, i32) {
    %c0_i32 = arith.constant 0 : i32
    %c0_i32_0 = arith.constant 0 : i32
    return %arg0, %c0_i32 : i32, i32
  }
}

</mosaic_0001>

<bundles_post_ra>
// kernel: actor_forward.1
= control target key start
LH: loop header
LB: loop body
LE: loop exit
PB: predicated region body
PF: predicated region fallthrough
CT: control target
= control target key end

     0   :  { %s2673_s0 = inlined_call_operand.hbm [shape: f32[256,64], index: 0, kind: input, shape index: {}]   ;;  %s2674_s1 = inlined_call_operand.hbm [shape: bf16[64,256], index: 1, kind: input, shape index: {}]   ;;  %s2675_s2 = inlined_call_operand.hbm [shape: f32[1,256], index: 2, kind: input, shape index: {}]   ;;  %s2676_s3 = inlined_call_operand.hbm [shape: bf16[256,256], index: 3, kind: input, shape index: {}]   ;;  %s2677_s4 = inlined_call_operand.hbm [shape: f32[1,256], index: 4, kind: input, shape index: {}]   ;;  %s2678_s5 = inlined_call_operand.hbm [shape: bf16[256,128], index: 5, kind: input, shape index: {}]   ;;  %s2679_s6 = inlined_call_operand.hbm [shape: f32[1,128], index: 6, kind: input, shape index: {}]   ;;  %s2680_s7 = inlined_call_operand.hbm [shape: f32[256,128], index: 7, kind: output, shape index: {}]  }
   0x1   :  { %2686 = sst [smem:[#allocation20_spill]] %s2674_s1 }
   0x2   :  { %12 = vsyncpa [#allocation3], 0 }
   0x3   :  { %14 = vsyncpa [#allocation3 + $0x1], 0 }
   0x4   :  { %15 = vsyncpa [#allocation6], 0 }
   0x5   :  { %16 = vsyncpa [#allocation9], 0 }
   0x6   :  { %17 = vsyncpa [#allocation12], 0 }
   0x7   :  { %18 = vsyncpa [#allocation4], 0 }
   0x8   :  { %20 = vsyncpa [#allocation4 + $0x1], 0  ;;  %s2152_s24 = smov 0   ;;  %s2154_s25 = smov 0  }
   0x9   :  { %s2156_s26 = smov 0   ;;  %s2158_s27 = smov 0  }
   0xa LB: > { %s2097_s28 = smov [#allocation5]   ;;  %s2173_s30 = sadd.s32 4294967295, %s2095_s27   ;;  %s2095_s27 = sphi %s2158_s27, %s2712_s27   ;;  %s2091_s26 = sphi %s2156_s26, %s2711_s26   ;;  %s2087_s25 = sphi %s2154_s25, %s2710_s25   ;;  %s2083_s24 = sphi %s2152_s24, %s2709_s24  }
   0xb   : > { %s221_s29 = sshll.u32 %s2097_s28, 4  ;;  %p1425_p0 = scmp.ge.s32.totalorder %s2095_s27, 1  ;;  %s2178_s29 = int_to_ptr.vmem [resolvable:$true] %s221_s29 }
   0xc   : > { %p2683_p1 = scmp.eq.s32.totalorder %s2173_s30, 0  ;;  %p209_p2 = scmp.lt.s32.totalorder %s2095_s27, 3 }
   0xd   : > { %s2098_s9 = smov [#allocation8]   ;;  %s2099_s12 = smov [#allocation11]  }
   0xe   : > { %p2180_p3 = pnand %p1425_p0, %p209_p2  ;;  %s245_s10 = sshll.u32 %s2098_s9, 4  ;;  %s2193_s10 = int_to_ptr.vmem [resolvable:$true] %s245_s10 }
   0xf   : > { %s269_s13 = sshll.u32 %s2099_s12, 4  ;;  %s2689_s1 = sld [smem:[#allocation20_spill]]  ;;  %s2195_s13 = int_to_ptr.vmem [resolvable:$true] %s269_s13 }
  0x10   : > { %s2687_s8 = scalar_select %p2180_p3, 1, 0 }
  0x11   : > { %p1625_p5 = pneg %p2180_p3 }
  0x13   : > { %p2189_p6 = pnand %p1625_p5, %p2683_p1 }
  0x15   : > { %s1819_s16 = scalar_lea.hbm %s2689_s1, 1024  ;;  %p2205_p8 = pneg %p2189_p6 }
  0x16   : > { %p1820_p7 = scmp.ne.s32.totalorder %s2689_s1, %s1819_s16  ;;  %p1826_p11 = scmp.lt.u32.totalorder %s1819_s16, %s2689_s1 }
  0x18   : > { %p1822_p9 = pnand %p2205_p8, %p1820_p7 }
  0x1a   : > { %p1823_p10 = pneg %p1822_p9 }
  0x1c   : > { %p1828_p12 = pnand %p1826_p11, %p1823_p10 }
  0x1e   : > { %1831 = shalt.err (!%p1828_p12)
}
  0x1f   : > { %s1832_s22 = scalar_lea.vmem %s2178_s29, 1024  ;;  %p1840_p5 = scmp.lt.s32.totalorder %s2178_s29, %s2178_s29 }
  0x20   : > { %p1833_p13 = scmp.ne.s32.totalorder %s2178_s29, %s1832_s22  ;;  %p1841_p4 = scmp.lt.s32.totalorder %s1832_s22, %s1832_s22 }
  0x22   : > { %p1835_p0 = pnand %p1833_p13, %p2205_p8  ;;  %p1842_p7 = por %p1841_p4, %p1840_p5 }
  0x24   : > { %p1836_p2 = pneg %p1835_p0 }
  0x26   : > { %p1843_p9 = pnand %p1842_p7, %p1836_p2 }
  0x28   : > { %1846 = shalt.err (!%p1843_p9)
}
  0x29   : > { %s2681_s23 = smov 128   ;;  %s2682_s28 = smov 8  }
  0x2a   : > { %1628 = dma.hbm_to_vmem [thread:$0]  (!%p2189_p6), %s2689_s1, 1024, %s2178_s29, [#allocation6], %s2681_s23, %s2681_s23, %s2682_s28  }
  0x2b   : > { %s1847_s16 = scalar_lea.hbm %s2676_s3, 4096 }
  0x2c   : > { %p1848_p4 = scmp.ne.s32.totalorder %s2676_s3, %s1847_s16  ;;  %p1854_p12 = scmp.lt.u32.totalorder %s1847_s16, %s2676_s3 }
  0x2e   : > { %p1850_p10 = pnand %p1848_p4, %p2205_p8 }
  0x30   : > { %p1851_p11 = pneg %p1850_p10 }
  0x32   : > { %p1856_p13 = pnand %p1854_p12, %p1851_p11 }
  0x34   : > { %1859 = shalt.err (!%p1856_p13)
}
  0x35   : > { %s1860_s29 = scalar_lea.vmem %s2193_s10, 4096  ;;  %p1868_p7 = scmp.lt.s32.totalorder %s2193_s10, %s2193_s10 }
  0x36   : > { %p1861_p0 = scmp.ne.s32.totalorder %s2193_s10, %s1860_s29  ;;  %p1869_p9 = scmp.lt.s32.totalorder %s1860_s29, %s1860_s29 }
  0x38   : > { %p1863_p2 = pnand %p1861_p0, %p2205_p8  ;;  %p1870_p4 = por %p1869_p9, %p1868_p7 }
  0x3a   : > { %p1864_p5 = pneg %p1863_p2 }
  0x3c   : > { %p1871_p10 = pnand %p1870_p4, %p1864_p5 }
  0x3e   : > { %1874 = shalt.err (!%p1871_p10)
}
  0x3f   : > { %1634 = dma.hbm_to_vmem [thread:$0]  (!%p2189_p6), %s2676_s3, 4096, %s2193_s10, [#allocation9], %s2681_s23, %s2681_s23, %s2682_s28  }
  0x40   : > { %s1875_s15 = scalar_lea.hbm %s2678_s5, 2048 }
  0x41   : > { %p1876_p11 = scmp.ne.s32.totalorder %s2678_s5, %s1875_s15  ;;  %p1882_p0 = scmp.lt.u32.totalorder %s1875_s15, %s2678_s5 }
  0x43   : > { %p1878_p12 = pnand %p1876_p11, %p2205_p8 }
  0x45   : > { %p1879_p13 = pneg %p1878_p12 }
  0x47   : > { %p1884_p2 = pnand %p1882_p0, %p1879_p13 }
  0x49   : > { %1887 = shalt.err (!%p1884_p2)
}
  0x4a   : > { %s1888_s10 = scalar_lea.vmem %s2195_s13, 2048  ;;  %p1896_p4 = scmp.lt.s32.totalorder %s2195_s13, %s2195_s13 }
  0x4b   : > { %p1889_p5 = scmp.ne.s32.totalorder %s2195_s13, %s1888_s10  ;;  %p1897_p10 = scmp.lt.s32.totalorder %s1888_s10, %s1888_s10 }
  0x4d   : > { %p1891_p7 = pnand %p1889_p5, %p2205_p8  ;;  %p1898_p11 = por %p1897_p10, %p1896_p4 }
  0x4f   : > { %p1892_p9 = pneg %p1891_p7 }
  0x51   : > { %p1899_p12 = pnand %p1898_p11, %p1892_p9 }
  0x53   : > { %1902 = shalt.err (!%p1899_p12)
}
  0x54   : > { %s2102_s21 = smov 64   ;;  %s2103_s29 = smov 4  }
  0x55   : > { %1640 = dma.hbm_to_vmem [thread:$0]  (!%p2189_p6), %s2678_s5, 2048, %s2195_s13, [#allocation12], %s2102_s21, %s2102_s21, %s2103_s29  }
  0x56   : > { %s2104_s12 = smov [#allocation7]   ;;  %s2105_s15 = smov [#allocation10]  }
  0x57   : > { %s235_s14 = sshll.u32 %s2104_s12, 4  ;;  %s259_s16 = sshll.u32 %s2105_s15, 4  ;;  %s236_s14 = int_to_ptr.vmem [resolvable:$true] %s235_s14  ;;  %s260_s16 = int_to_ptr.vmem [resolvable:$true] %s259_s16 }
  0x58   : > { %s1903_s20 = scalar_lea.hbm %s2675_s2, 32 }
  0x59   : > { %p1904_p13 = scmp.ne.s32.totalorder %s2675_s2, %s1903_s20  ;;  %p1910_p5 = scmp.lt.u32.totalorder %s1903_s20, %s2675_s2 }
  0x5b   : > { %p1906_p0 = pnand %p1904_p13, %p2205_p8 }
  0x5d   : > { %p1907_p2 = pneg %p1906_p0 }
  0x5f   : > { %p1912_p7 = pnand %p1910_p5, %p1907_p2 }
  0x61   : > { %1915 = shalt.err (!%p1912_p7)
}
  0x62   : > { %s1916_s13 = scalar_lea.vmem %s236_s14, 32  ;;  %p1924_p11 = scmp.lt.s32.totalorder %s236_s14, %s236_s14 }
  0x63   : > { %p1917_p9 = scmp.ne.s32.totalorder %s236_s14, %s1916_s13  ;;  %p1925_p12 = scmp.lt.s32.totalorder %s1916_s13, %s1916_s13 }
  0x65   : > { %p1919_p4 = pnand %p1917_p9, %p2205_p8  ;;  %p1926_p1 = por %p1925_p12, %p1924_p11 }
  0x67   : > { %p1920_p10 = pneg %p1919_p4 }
  0x69   : > { %p1927_p3 = pnand %p1926_p1, %p1920_p10 }
  0x6b   : > { %1930 = shalt.err (!%p1927_p3)
}
  0x6c   : > { %1631 = dma.hbm_to_vmem [thread:$0]  (!%p2189_p6), %s2675_s2, 32, %s236_s14, [#allocation6]  }
  0x6d   : > { %s1931_s29 = scalar_lea.hbm %s2677_s4, 32 }
  0x6e   : > { %p1932_p13 = scmp.ne.s32.totalorder %s2677_s4, %s1931_s29  ;;  %p1938_p3 = scmp.lt.u32.totalorder %s1931_s29, %s2677_s4 }
  0x70   : > { %p1934_p0 = pnand %p1932_p13, %p2205_p8 }
  0x72   : > { %p1935_p1 = pneg %p1934_p0 }
  0x74   : > { %p1940_p2 = pnand %p1938_p3, %p1935_p1 }
  0x76   : > { %1943 = shalt.err (!%p1940_p2)
}
  0x77   : > { %s1944_s17 = scalar_lea.vmem %s260_s16, 32  ;;  %p1952_p4 = scmp.lt.s32.totalorder %s260_s16, %s260_s16 }
  0x78   : > { %p1945_p5 = scmp.ne.s32.totalorder %s260_s16, %s1944_s17  ;;  %p1953_p10 = scmp.lt.s32.totalorder %s1944_s17, %s1944_s17 }
  0x7a   : > { %p1947_p7 = pnand %p1945_p5, %p2205_p8  ;;  %p1954_p11 = por %p1953_p10, %p1952_p4 }
  0x7c   : > { %p1948_p9 = pneg %p1947_p7 }
  0x7e   : > { %p1955_p12 = pnand %p1954_p11, %p1948_p9 }
  0x80   : > { %1958 = shalt.err (!%p1955_p12)
}
  0x81   : > { %1637 = dma.hbm_to_vmem [thread:$0]  (!%p2189_p6), %s2677_s4, 32, %s260_s16, [#allocation9]  }
  0x82   : > { %s2106_s20 = smov [#allocation13]   ;;  %s1959_s21 = scalar_lea.hbm %s2679_s6, 16 }
  0x83   : > { %s283_s10 = sshll.u32 %s2106_s20, 4  ;;  %p1960_p13 = scmp.ne.s32.totalorder %s2679_s6, %s1959_s21  ;;  %s284_s10 = int_to_ptr.vmem [resolvable:$true] %s283_s10 }
  0x84   : > { %p1966_p3 = scmp.lt.u32.totalorder %s1959_s21, %s2679_s6 }
  0x85   : > { %p1962_p0 = pnand %p1960_p13, %p2205_p8 }
  0x87   : > { %p1963_p1 = pneg %p1962_p0 }
  0x89   : > { %p1968_p2 = pnand %p1966_p3, %p1963_p1 }
  0x8b   : > { %1971 = shalt.err (!%p1968_p2)
}
  0x8c   : > { %s1972_s16 = scalar_lea.vmem %s284_s10, 16  ;;  %s1979_s9 = scalar_lea.vmem %s284_s10, 32 }
  0x8d   : > { %p1973_p5 = scmp.ne.s32.totalorder %s284_s10, %s1972_s16  ;;  %p1980_p4 = scmp.lt.s32.totalorder %s284_s10, %s284_s10 }
  0x8e   : > { %p1981_p10 = scmp.lt.s32.totalorder %s1979_s9, %s1972_s16 }
  0x8f   : > { %p1975_p7 = pnand %p1973_p5, %p2205_p8 }
  0x90   : > { %p1982_p11 = por %p1981_p10, %p1980_p4 }
  0x91   : > { %p1976_p9 = pneg %p1975_p7 }
  0x93   : > { %p1983_p12 = pnand %p1982_p11, %p1976_p9 }
  0x95   : > { %1986 = shalt.err (!%p1983_p12)
}
  0x96   : > { %1643 = dma.hbm_to_vmem [thread:$0]  (!%p2189_p6), %s2679_s6, 16, %s284_s10, [#allocation12]  }
  0x97   : > { %s1424_s19 = sadd.s32 4294967294, %s2095_s27   ;;  %s2334_s11 = sadd.s32 1, %s2095_s27  }
  0x98   : > { %s30_s17 = ssub.s32 %s2095_s27, %s2334_s11  ;;  %s33_s14 = sadd.s32 1, %s2091_s26 }
  0x99   : > { %p31_p8 = scmp.eq.s32.totalorder %s30_s17, 0  ;;  %p40_p13 = scmp.ne.s32.totalorder %s2091_s26, %s2087_s25 }
  0x9a   : > { %p41_p0 = scmp.eq.s32.totalorder %s2095_s27, 0  ;;  %p46_p1 = scmp.ne.s32.totalorder %s2087_s25, %s2083_s24 }
  0x9b   : > { %s2345_s18 = scalar_select %p31_p8, %s2091_s26, %s33_s14  }
  0x9c   : > { %p2347_p3 = por %p41_p0, %p40_p13  ;;  %p2692_p2 = scmp.eq.s32.totalorder %s2173_s30, 0 }
  0x9d   : > { %p196_p5 = scmp.eq.s32.totalorder %s2173_s30, 1  ;;  %p202_p7 = scmp.eq.s32.totalorder %s1424_s19, 1 }
  0x9e   : > { %p2353_p6 = por %p2692_p2, %p46_p1  ;;  %p1658_p9 = scmp.lt.s32.totalorder %s2095_s27, 2 }
  0x9f   : > { %s294_s13 = sand.u32 1, %s2091_s26   ;;  %p2360_p4 = por %p196_p5, %p40_p13 }
  0xa0   : > { %p2364_p10 = por %p202_p7, %p46_p1  ;;  %s1433_s1 = sshll.u32 %s294_s13, 7 }
  0xa1   : > { %s2694_s23 = scalar_select %p2360_p4, 1, 0 }
  0xa2   : > { %s2695_s21 = scalar_select %p2364_p10, 1, 0 }
  0xa3   : > { %s1515_s28 = sshll.u32 %s2095_s27, 11  ;;  %s298_s9 = scalar_lea.vmem [#allocation2], %s1433_s1 }
  0xa4   : > { %s2372_s16 = scalar_lea.hbm %s2673_s0, %s1515_s28  ;;  %s305_s12 = sshll.u32 %s298_s9, 4  ;;  %s2374_s12 = int_to_ptr.vmem [resolvable:$true] %s305_s12 }
  0xa5   : > { %p2378_p11 = pnand %p1658_p9, %p2347_p3  ;;  %s2382_s19 = scalar_lea.sflag [#allocation3], %s294_s13 }
  0xa6   : > { %s1987_s17 = scalar_lea.hbm %s2372_s16, 2048  ;;  %s1992_s20 = scalar_lea.hbm %s2673_s0, 4096 }
  0xa7   : > { %p1988_p12 = scmp.ne.s32.totalorder %s2372_s16, %s1987_s17  ;;  %p1989_p8 = pneg %p2378_p11 }
  0xa8   : > { %p1993_p1 = scmp.lt.u32.totalorder %s2372_s16, %s2673_s0  ;;  %p1994_p3 = scmp.lt.u32.totalorder %s1992_s20, %s1987_s17 }
  0xa9   : > { %p1990_p13 = pnand %p1989_p8, %p1988_p12  ;;  %p1996_p5 = scmp.lt.u32.totalorder %s1987_s17, %s2372_s16 }
  0xaa   : > { %p1995_p2 = por %p1994_p3, %p1993_p1 }
  0xab   : > { %p1991_p0 = pneg %p1990_p13 }
  0xac   : > { %p1997_p7 = por %p1996_p5, %p1995_p2 }
  0xae   : > { %p1998_p9 = pnand %p1997_p7, %p1991_p0 }
  0xb0   : > { %2001 = shalt.err (!%p1998_p9)
}
  0xb1   : > { %s2002_s13 = scalar_lea.vmem %s2374_s12, 2048  ;;  %s2107_s22 = smov [#allocation2]  }
  0xb2   : > { %p2003_p12 = scmp.ne.s32.totalorder %s2374_s12, %s2002_s13  ;;  %s2007_s9 = sshll.u32 %s2107_s22, 4  ;;  %s2008_s9 = int_to_ptr.vmem [resolvable:$false] %s2007_s9 }
  0xb3   : > { %s2009_s14 = scalar_lea.vmem %s2008_s9, 4096  ;;  %p2010_p4 = scmp.lt.s32.totalorder %s2374_s12, %s2008_s9 }
  0xb4   : > { %p2005_p13 = pnand %p2003_p12, %p1989_p8  ;;  %p2011_p1 = scmp.lt.s32.totalorder %s2009_s14, %s2002_s13 }
  0xb6   : > { %p2006_p10 = pneg %p2005_p13  ;;  %p2012_p3 = por %p2011_p1, %p2010_p4 }
  0xb8   : > { %p2013_p2 = pnand %p2012_p3, %p2006_p10 }
  0xba   : > { %2016 = shalt.err (!%p2013_p2)
}
  0xbb   : > { %s2697_s17 = smov 8   ;;  %s2698_s1 = smov 128  }
  0xbc   : > { %1647 = dma.hbm_to_vmem [thread:$0]  (!%p2378_p11), %s2372_s16, 2048, %s2374_s12, %s2382_s19, %s2698_s1, %s2698_s1, %s2697_s17  }
  0xbd   : > { %p2699_p8 = scmp.ne.s32.totalorder %s2687_s8, 0 }
  0xbe   : > { %s2416_s20 = sand.u32 (!%p2699_p8), 1, %s2087_s25  }
  0xbf   : > { %317 = sbr.rel (%p2699_p8) target bundleno = 971 (0x3cb), region = 48  ;;  %s1437_s28 = sshll.u32 (!%p2699_p8), %s2416_s20, 7 }
  0xc0   : > { %s320_s29 = scalar_lea.sflag (!%p2699_p8), [#allocation3], %s2416_s20  ;;  %s2422_s15 = scalar_lea.vmem (!%p2699_p8), [#allocation2], %s1437_s28 }
  0xc6   : > { %2062 = dma.done.wait (%p2353_p6), %s320_s29, 2048  }
  0xc7   : > { %2064 = vsyncadd (%p2353_p6), %s320_s29, 4294965248  ;;  %p2700_p4 = scmp.eq.s32.totalorder %s2173_s30, 0 }
  0xc9   : > { %2066 = dma.done.wait (%p2700_p4), [#allocation6], 1056   ;;  %p2701_p10 = pmov %p2700_p4 }
  0xca   : > { %p2702_p11 = pmov %p2700_p4 }
  0xcb   : > { %2068 = vsyncadd (%p2701_p10), [#allocation6], 4294966240 }
  0xcc   : > { %2070 = dma.done.wait (%p2702_p11), [#allocation9], 4128   ;;  %p2703_p0 = pmov %p2700_p4 }
  0xce   : > { %2072 = vsyncadd (%p2703_p0), [#allocation9], 4294963168  ;;  %p2704_p5 = pmov %p2703_p0 }
  0xcf   : > { %p2705_p7 = pmov %p2703_p0 }
  0xd0   : > { %2074 = dma.done.wait (%p2704_p5), [#allocation12], 2064  }
  0xd1   : > { %2076 = vsyncadd (%p2705_p7), [#allocation12], 4294965232  ;;  %v2108_v0 = vmov 0   ;;  %v1711_v1 = vld [vmem:[#allocation5 + $0x4] ss:$8 sps:$4 sm:$0xff]   ;;  %vm465_vm0 = vcmask 523264  }
  0xd2   : > { %522 = vmatprep.mubr.bf16.mxu0 %v2108_v0  ;;  %v1713_v2 = vld [vmem:[#allocation5] ss:$8 sps:$4 sm:$0xff]   ;;  %490 = vmatprep.subr.bf16.mxu0 %v1711_v1  ;;  %v1714_v3 = vld [vmem:[#allocation5 + $0x14] ss:$8 sps:$4 sm:$0xff]   ;;  %v1716_v4 = vld [vmem:[#allocation5 + $0x10] ss:$8 sps:$4 sm:$0xff]  }
  0xd3   : > { %491 = vmatpush1.bf16.msra.mxu0 %v1713_v2  ;;  %v1717_v5 = vld [vmem:[#allocation5 + $0x24] ss:$8 sps:$4 sm:$0xff]   ;;  %v1719_v6 = vld [vmem:[#allocation5 + $0x20] ss:$8 sps:$4 sm:$0xff]   ;;  %v1720_v7 = vld [vmem:[#allocation5 + $0x34] ss:$8 sps:$4 sm:$0xff]  }
  0xd4   : > { %492 = vmatprep.subr.bf16.mxu0 %v1714_v3  ;;  %v1722_v8 = vld [vmem:[#allocation5 + $0x30] ss:$8 sps:$4 sm:$0xff]   ;;  %v381_v9 = vld [vmem:[%s2422_s15] sm:$0xff]  ;;  %v382_v10 = vld [vmem:[%s2422_s15 + $0x8] sm:$0xff]  ;;  %s2592_s8 = scalar_lea.vmem [#allocation14], %s1437_s28  ;;  %s1516_s10 = sshll.u32 %s2173_s30, 11 }
  0xd5   : > { %v1723_v11 = vld [vmem:[#allocation8 + $0x4] ss:$8 sps:$4 sm:$0xff]   ;;  %v1725_v12 = vld [vmem:[#allocation8] ss:$8 sps:$4 sm:$0xff]   ;;  %v1726_v13 = vld [vmem:[#allocation8 + $0x14] ss:$8 sps:$4 sm:$0xff]   ;;  %v397_v14 = vpack.c.bf16 %v382_v10, %v381_v9  ;;  %s2625_s13 = scalar_lea.hbm %s2680_s7, %s1516_s10 }
  0xd6   : > { %855 = vmatprep.subr.bf16.mxu1 %v1723_v11  ;;  %v1728_v15 = vld [vmem:[#allocation8 + $0x10] ss:$8 sps:$4 sm:$0xff]   ;;  %v1729_v16 = vld [vmem:[#allocation8 + $0x24] ss:$8 sps:$4 sm:$0xff]   ;;  %v1731_v18 = vld [vmem:[#allocation8 + $0x20] ss:$8 sps:$4 sm:$0xff]  }
  0xd7   : > { %493 = vmatpush1.bf16.msra.mxu0 %v1716_v4  ;;  %856 = vmatpush1.bf16.msra.mxu1 %v1725_v12  ;;  %v383_v17 = vld [vmem:[%s2422_s15 + $0x10] sm:$0xff]  ;;  %v384_v19 = vld [vmem:[%s2422_s15 + $0x18] sm:$0xff]  ;;  %v385_v24 = vld [vmem:[%s2422_s15 + $0x20] sm:$0xff]  ;;  %s1294_s16 = sshll.u32 %s2592_s8, 4  ;;  %s1281_s22 = scalar_lea.sflag [#allocation4], %s2416_s20  ;;  %s2627_s16 = int_to_ptr.vmem [resolvable:$true] %s1294_s16 }
  0xd8   : > { %494 = vmatprep.subr.bf16.mxu0 %v1717_v5  ;;  %857 = vmatprep.subr.bf16.mxu1 %v1726_v13  ;;  %v1732_v20 = vld [vmem:[#allocation8 + $0x34] ss:$8 sps:$4 sm:$0xff]   ;;  %v398_v21 = vpack.c.bf16 %v384_v19, %v383_v17  ;;  %v1734_v22 = vld [vmem:[#allocation8 + $0x30] ss:$8 sps:$4 sm:$0xff]   ;;  %v1735_v23 = vld [vmem:[#allocation8 + $0x44] ss:$8 sps:$4 sm:$0xff]   ;;  %v415_v13 = vlaneseq }
  0xd9   : > { %v1737_v25 = vld [vmem:[#allocation8 + $0x40] ss:$8 sps:$4 sm:$0xff]   ;;  %v1738_v27 = vld [vmem:[#allocation8 + $0x54] ss:$8 sps:$4 sm:$0xff]   ;;  %v1740_v28 = vld [vmem:[#allocation8 + $0x50] ss:$8 sps:$4 sm:$0xff]  }
  0xda   : > { %v386_v26 = vld [vmem:[%s2422_s15 + $0x28] sm:$0xff]  ;;  %v387_v32 = vld [vmem:[%s2422_s15 + $0x30] sm:$0xff]  ;;  %v388_v33 = vld [vmem:[%s2422_s15 + $0x38] sm:$0xff]  ;;  %s2017_s9 = scalar_lea.vmem %s2627_s16, 2048  ;;  %p2706_p9 = scmp.ne.s32.totalorder %s2694_s23, 0 }
  0xdb   : > { %495 = vmatpush1.bf16.msra.mxu0 %v1719_v6  ;;  %858 = vmatpush1.bf16.msra.mxu1 %v1728_v15  ;;  %v1741_v29 = vld [vmem:[#allocation8 + $0x64] ss:$8 sps:$4 sm:$0xff]   ;;  %v399_v30 = vpack.c.bf16 %v386_v26, %v385_v24  ;;  %v1743_v31 = vld [vmem:[#allocation8 + $0x60] ss:$8 sps:$4 sm:$0xff]   ;;  %v1744_v34 = vld [vmem:[#allocation8 + $0x74] ss:$8 sps:$4 sm:$0xff]   ;;  %v400_v37 = vpack.c.bf16 %v388_v33, %v387_v32  ;;  %p2018_p6 = scmp.ne.s32.totalorder %s2627_s16, %s2017_s9 }
  0xdc   : > { %496 = vmatprep.subr.bf16.mxu0 %v1720_v7  ;;  %859 = vmatprep.subr.bf16.mxu1 %v1729_v16  ;;  %v1746_v35 = vld [vmem:[#allocation8 + $0x70] ss:$8 sps:$4 sm:$0xff]   ;;  %v1747_v36 = vld [vmem:[#allocation8 + $0x84] ss:$8 sps:$4 sm:$0xff]   ;;  %v1749_v38 = vld [vmem:[#allocation8 + $0x80] ss:$8 sps:$4 sm:$0xff]  }
  0xdd   : > { %v389_v39 = vld [vmem:[%s2422_s15 + $0x40] sm:$0xff]  ;;  %v390_v40 = vld [vmem:[%s2422_s15 + $0x48] sm:$0xff]  ;;  %v1752_v43 = vld [vmem:[#allocation8 + $0x90] ss:$8 sps:$4 sm:$0xff]   ;;  %p2019_p12 = pnand %p2018_p6, %p2706_p9  ;;  %s2109_s30 = smov [#allocation14]  }
  0xde   : > { %v1750_v41 = vld [vmem:[#allocation8 + $0x94] ss:$8 sps:$4 sm:$0xff]   ;;  %v401_v42 = vpack.c.bf16 %v390_v40, %v389_v39  ;;  %v1753_v44 = vld [vmem:[#allocation8 + $0xa4] ss:$8 sps:$4 sm:$0xff]   ;;  %v1755_v45 = vld [vmem:[#allocation8 + $0xa0] ss:$8 sps:$4 sm:$0xff]  }
  0xdf   : > { %497 = vmatpush1.bf16.msra.mxu0 %v1722_v8  ;;  %860 = vmatpush1.bf16.msra.mxu1 %v1731_v18  ;;  %v391_v46 = vld [vmem:[%s2422_s15 + $0x50] sm:$0xff]  ;;  %v392_v47 = vld [vmem:[%s2422_s15 + $0x58] sm:$0xff]  ;;  %v1761_v52 = vld [vmem:[#allocation8 + $0xc0] ss:$8 sps:$4 sm:$0xff]   ;;  %p2020_p13 = pneg %p2019_p12  ;;  %s2021_s14 = sshll.u32 %s2109_s30, 4  ;;  %s2022_s14 = int_to_ptr.vmem [resolvable:$false] %s2021_s14 }
  0xe0   : > { %861 = vmatprep.subr.bf16.mxu1 %v1732_v20  ;;  %v1756_v48 = vld [vmem:[#allocation8 + $0xb4] ss:$8 sps:$4 sm:$0xff]   ;;  %v402_v49 = vpack.c.bf16 %v392_v47, %v391_v46  ;;  %v1758_v50 = vld [vmem:[#allocation8 + $0xb0] ss:$8 sps:$4 sm:$0xff]   ;;  %v1759_v51 = vld [vmem:[#allocation8 + $0xc4] ss:$8 sps:$4 sm:$0xff]   ;;  %p2024_p1 = scmp.lt.s32.totalorder %s2627_s16, %s2022_s14 }
  0xe1   : > { %v393_v53 = vld [vmem:[%s2422_s15 + $0x60] sm:$0xff]  ;;  %v394_v54 = vld [vmem:[%s2422_s15 + $0x68] sm:$0xff]  ;;  %v395_v57 = vld [vmem:[%s2422_s15 + $0x70] sm:$0xff]  ;;  %s2023_s17 = scalar_lea.vmem %s2022_s14, 4096 }
  0xe2   : > { %1453 = vmatmul.mubr.msk.bf16.vlgmr.msra.gmra.mrb[0].mxu0 %vm465_vm0, %v397_v14  ;;  %v1762_v55 = vld [vmem:[#allocation8 + $0xd4] ss:$8 sps:$4 sm:$0xff]   ;;  %v403_v56 = vpack.c.bf16 %v394_v54, %v393_v53  ;;  %v1764_v60 = vld [vmem:[#allocation8 + $0xd0] ss:$8 sps:$4 sm:$0xff]   ;;  %v1765_v61 = vld [vmem:[#allocation8 + $0xe4] ss:$8 sps:$4 sm:$0xff]   ;;  %p2025_p3 = scmp.lt.s32.totalorder %s2023_s17, %s2017_s9 }
  0xe3   : > { %532 = vmatprep.mubr.bf16.mxu0 %v2108_v0  ;;  %862 = vmatpush1.bf16.msra.mxu1 %v1734_v22  ;;  %v396_v58 = vld [vmem:[%s2422_s15 + $0x78] sm:$0xff]  ;;  %v1767_v62 = vld [vmem:[#allocation8 + $0xe0] ss:$8 sps:$4 sm:$0xff]   ;;  %v2493_v14 = vshrl.u32 %v415_v13, 7  ;;  %v413_v16 = vld [vmem:[#allocation7] sm:$0x3] }
  0xe4   : > { %863 = vmatprep.subr.bf16.mxu1 %v1735_v23  ;;  %v404_v59 = vpack.c.bf16 %v396_v58, %v395_v57  ;;  %v1768_v63 = vld [vmem:[#allocation8 + $0xf4] ss:$8 sps:$4 sm:$0xff]   ;;  %v1770_v1 = vld [vmem:[#allocation8 + $0xf0] ss:$8 sps:$4 sm:$0xff]   ;;  %v1771_v2 = vld [vmem:[#allocation11 + $0x40] sm:$0xff]   ;;  %p2026_p2 = por %p2025_p3, %p2024_p1 }
  0xe5   : > { %v1772_v3 = vld [vmem:[#allocation11] sm:$0xff]   ;;  %v1773_v4 = vld [vmem:[#allocation11 + $0x48] sm:$0xff]   ;;  %1517 = vmatprep.subr.bf16.mxu0 %v1771_v2  ;;  %v1775_v5 = vld [vmem:[#allocation11 + $0x50] sm:$0xff]   ;;  %v417_v15 = vsub.s32 0, %v2493_v14  ;;  %v421_v17 = vsub.s32 1, %v2493_v14 }
  0xe6   : > { %1518 = vmatpush3.bf16.msra.mxu0 %v1772_v3  ;;  %v2472_v6 = vld [vmem:[#allocation11 + $0x10] sm:$0xff]   ;;  %v2474_v7 = vld [vmem:[#allocation11 + $0x58] sm:$0xff]   ;;  %v2480_v9 = vld [vmem:[#allocation11 + $0x60] sm:$0xff]   ;;  %p2027_p8 = pnand %p2026_p2, %p2020_p13 }
  0xe7   : > { %864 = vmatpush1.bf16.msra.mxu1 %v1737_v25  ;;  %1519 = vmatprep.subr.bf16.mxu0 %v1773_v4  ;;  %v2477_v8 = vld [vmem:[#allocation11 + $0x18] sm:$0xff]   ;;  %v2483_v10 = vld [vmem:[#allocation11 + $0x20] sm:$0xff]   ;;  %v2486_v11 = vld [vmem:[#allocation11 + $0x68] sm:$0xff]   ;;  %v2499_v18 = vrot.slane %v413_v16, %v417_v15  ;;  %v2503_v19 = vrot.slane %v413_v16, %v421_v17 }
  0xe8   : > { %865 = vmatprep.subr.bf16.mxu1 %v1738_v27  ;;  %v2489_v12 = vld [vmem:[#allocation11 + $0x28] sm:$0xff]  }
  0xea   : > { %1454 = vmatmul.mubr.msk.bf16.gmra.mrb[4].mxu0 %vm465_vm0, %v398_v21 }
  0xeb   : > { %542 = vmatprep.mubr.bf16.mxu0 %v2108_v0  ;;  %866 = vmatpush1.bf16.msra.mxu1 %v1740_v28 }
  0xec   : > { %867 = vmatprep.subr.bf16.mxu1 %v1741_v29 }
  0xef   : > { %868 = vmatpush1.bf16.msra.mxu1 %v1743_v31 }
  0xf0   : > { %869 = vmatprep.subr.bf16.mxu1 %v1744_v34 }
  0xf2   : > { %1455 = vmatmul.mubr.msk.bf16.gmra.mrb[8].mxu0 %vm465_vm0, %v399_v30 }
  0xf3   : > { %552 = vmatprep.mubr.bf16.mxu0 %v2108_v0  ;;  %870 = vmatpush1.bf16.msra.mxu1 %v1746_v35 }
  0xf4   : > { %871 = vmatprep.subr.bf16.mxu1 %v1747_v36 }
  0xf7   : > { %872 = vmatpush1.bf16.msra.mxu1 %v1749_v38 }
  0xf8   : > { %873 = vmatprep.subr.bf16.mxu1 %v1750_v41 }
  0xfa   : > { %1456 = vmatmul.mubr.msk.bf16.gmra.mrb[12].mxu0 %vm465_vm0, %v400_v37 }
  0xfb   : > { %562 = vmatprep.mubr.bf16.mxu0 %v2108_v0  ;;  %874 = vmatpush1.bf16.msra.mxu1 %v1752_v43 }
  0xfc   : > { %875 = vmatprep.subr.bf16.mxu1 %v1753_v44 }
  0xff   : > { %876 = vmatpush1.bf16.msra.mxu1 %v1755_v45 }
 0x100   : > { %877 = vmatprep.subr.bf16.mxu1 %v1756_v48 }
 0x102   : > { %1457 = vmatmul.mubr.msk.bf16.gmra.mrb[16].mxu0 %vm465_vm0, %v401_v42 }
 0x103   : > { %572 = vmatprep.mubr.bf16.mxu0 %v2108_v0  ;;  %878 = vmatpush1.bf16.msra.mxu1 %v1758_v50 }
 0x104   : > { %879 = vmatprep.subr.bf16.mxu1 %v1759_v51 }
 0x107   : > { %880 = vmatpush1.bf16.msra.mxu1 %v1761_v52 }
 0x108   : > { %881 = vmatprep.subr.bf16.mxu1 %v1762_v55 }
 0x10a   : > { %1458 = vmatmul.mubr.msk.bf16.gmra.mrb[20].mxu0 %vm465_vm0, %v402_v49 }
 0x10b   : > { %582 = vmatprep.mubr.bf16.mxu0 %v2108_v0  ;;  %882 = vmatpush1.bf16.msra.mxu1 %v1764_v60 }
 0x10c   : > { %883 = vmatprep.subr.bf16.mxu1 %v1765_v61 }
 0x10f   : > { %884 = vmatpush1.bf16.msra.mxu1 %v1767_v62 }
 0x110   : > { %885 = vmatprep.subr.bf16.mxu1 %v1768_v63 }
 0x112   : > { %1459 = vmatmul.mubr.msk.bf16.gmra.mrb[24].mxu0 %vm465_vm0, %v403_v56 }
 0x113   : > { %592 = vmatprep.mubr.bf16.mxu0 %v2108_v0  ;;  %886 = vmatpush1.bf16.msra.mxu1 %v1770_v1  ;;  %v1774_v0 = vld [vmem:[#allocation11 + $0x8] sm:$0xff]  }
 0x114   : > { %1581 = vmatprep.subr.bf16.mxu1 %v1771_v2  ;;  %1520 = vmatpush3.bf16.msra.mxu0 %v1774_v0 }
 0x115   : > { %1521 = vmatprep.subr.bf16.mxu0 %v1775_v5 }
 0x118   : > { %1522 = vmatpush3.bf16.msra.mxu0 %v2472_v6 }
 0x119   : > { %1523 = vmatprep.subr.bf16.mxu0 %v2474_v7 }
 0x11a   : > { %1460 = vmatmul.mubr.msk.bf16.gmra.mrb[28].mxu0 %vm465_vm0, %v404_v59 }
 0x11c   : > { %1524 = vmatpush3.bf16.msra.mxu0 %v2477_v8 }
 0x11d   : > { %1525 = vmatprep.subr.bf16.mxu0 %v2480_v9 }
 0x120   : > { %1526 = vmatpush3.bf16.msra.mxu0 %v2483_v10 }
 0x121   : > { %1527 = vmatprep.subr.bf16.mxu0 %v2486_v11 }
 0x124   : > { %1528 = vmatpush3.bf16.msra.mxu0 %v2489_v12 }
 0x1b5   : > { %v524_v20 = vpop.f32.mrb[0].mxu0 }
 0x1b6   : > { %v525_v21 = vadd.f32 %v524_v20, %v2499_v18  ;;  %v526_v22 = vpop.f32.mrb[1].mxu0 }
 0x1b7   : > { %v527_v23 = vadd.f32 %v526_v22, %v2503_v19  ;;  %v528_v24 = vpop.f32.mrb[2].mxu0 }
 0x1b8   : > { %v529_v25 = vadd.f32 %v528_v24, %v2499_v18  ;;  %v530_v26 = vpop.f32.mrb[3].mxu0  ;;  %v603_v28 = vmax.f32 %v525_v21, 0.0 }
 0x1b9   : > { %v531_v27 = vadd.f32 %v530_v26, %v2503_v19  ;;  %v604_v30 = vmax.f32 %v527_v23, 0.0 }
 0x1ba   : > { %v605_v29 = vmax.f32 %v529_v25, 0.0 }
 0x1bb   : > { %v606_v31 = vmax.f32 %v531_v27, 0.0 }
 0x1bc   : > { %v635_v32 = vpack.c.bf16 %v605_v29, %v603_v28 }
 0x1bd   : > { %v534_v33 = vpop.f32.mrb[4].mxu0  ;;  %v636_v34 = vpack.c.bf16 %v606_v31, %v604_v30 }
 0x1be   : > { %v535_v35 = vadd.f32 %v534_v33, %v2499_v18  ;;  %v536_v36 = vpop.f32.mrb[5].mxu0 }
 0x1bf   : > { %v537_v37 = vadd.f32 %v536_v36, %v2503_v19  ;;  %v538_v38 = vpop.f32.mrb[6].mxu0  ;;  %887 = vmatprep.mubr.bf16.mxu1 %v636_v34 }
 0x1c0   : > { %v539_v39 = vadd.f32 %v538_v38, %v2499_v18  ;;  %v540_v40 = vpop.f32.mrb[7].mxu0  ;;  %888 = vmatmul.mubr.bf16.vlgmr.msra.gmra.mrb[0].mxu1 %v635_v32  ;;  %v607_v42 = vmax.f32 %v535_v35, 0.0 }
 0x1c1   : > { %v541_v41 = vadd.f32 %v540_v40, %v2503_v19  ;;  %1589 = vmatpush3.bf16.msra.mxu1 %v1772_v3  ;;  %v608_v44 = vmax.f32 %v537_v37, 0.0 }
 0x1c2   : > { %v609_v43 = vmax.f32 %v539_v39, 0.0  ;;  %1582 = vmatprep.subr.bf16.mxu1 %v1773_v4 }
 0x1c3   : > { %v610_v45 = vmax.f32 %v541_v41, 0.0 }
 0x1c4   : > { %v637_v46 = vpack.c.bf16 %v609_v43, %v607_v42 }
 0x1c5   : > { %v638_v47 = vpack.c.bf16 %v610_v45, %v608_v44  ;;  %v544_v48 = vpop.f32.mrb[8].mxu0  ;;  %1590 = vmatpush3.bf16.msra.mxu1 %v1774_v0 }
 0x1c6   : > { %v545_v49 = vadd.f32 %v544_v48, %v2499_v18  ;;  %v546_v50 = vpop.f32.mrb[9].mxu0  ;;  %1583 = vmatprep.subr.bf16.mxu1 %v1775_v5 }
 0x1c7   : > { %v547_v51 = vadd.f32 %v546_v50, %v2503_v19  ;;  %v548_v52 = vpop.f32.mrb[10].mxu0  ;;  %897 = vmatprep.mubr.bf16.mxu1 %v638_v47 }
 0x1c8   : > { %v549_v53 = vadd.f32 %v548_v52, %v2499_v18  ;;  %v550_v54 = vpop.f32.mrb[11].mxu0  ;;  %898 = vmatmul.mubr.bf16.gmra.mrb[4].mxu1 %v637_v46  ;;  %v611_v56 = vmax.f32 %v545_v49, 0.0 }
 0x1c9   : > { %v551_v55 = vadd.f32 %v550_v54, %v2503_v19  ;;  %1591 = vmatpush3.bf16.msra.mxu1 %v2472_v6  ;;  %v612_v58 = vmax.f32 %v547_v51, 0.0 }
 0x1ca   : > { %v613_v57 = vmax.f32 %v549_v53, 0.0  ;;  %1584 = vmatprep.subr.bf16.mxu1 %v2474_v7 }
 0x1cb   : > { %v614_v59 = vmax.f32 %v551_v55, 0.0 }
 0x1cc   : > { %v639_v60 = vpack.c.bf16 %v613_v57, %v611_v56 }
 0x1cd   : > { %v640_v61 = vpack.c.bf16 %v614_v59, %v612_v58  ;;  %v554_v62 = vpop.f32.mrb[12].mxu0  ;;  %1592 = vmatpush3.bf16.msra.mxu1 %v2477_v8 }
 0x1ce   : > { %v555_v63 = vadd.f32 %v554_v62, %v2499_v18  ;;  %v556_v1 = vpop.f32.mrb[13].mxu0  ;;  %1585 = vmatprep.subr.bf16.mxu1 %v2480_v9 }
 0x1cf   : > { %v557_v2 = vadd.f32 %v556_v1, %v2503_v19  ;;  %v558_v3 = vpop.f32.mrb[14].mxu0  ;;  %907 = vmatprep.mubr.bf16.mxu1 %v640_v61 }
 0x1d0   : > { %v559_v4 = vadd.f32 %v558_v3, %v2499_v18  ;;  %v560_v0 = vpop.f32.mrb[15].mxu0  ;;  %908 = vmatmul.mubr.bf16.gmra.mrb[8].mxu1 %v639_v60  ;;  %v615_v6 = vmax.f32 %v555_v63, 0.0 }
 0x1d1   : > { %v561_v5 = vadd.f32 %v560_v0, %v2503_v19  ;;  %1593 = vmatpush3.bf16.msra.mxu1 %v2483_v10  ;;  %v616_v8 = vmax.f32 %v557_v2, 0.0 }
 0x1d2   : > { %v617_v7 = vmax.f32 %v559_v4, 0.0  ;;  %1586 = vmatprep.subr.bf16.mxu1 %v2486_v11 }
 0x1d3   : > { %v618_v13 = vmax.f32 %v561_v5, 0.0 }
 0x1d4   : > { %v641_v16 = vpack.c.bf16 %v617_v7, %v615_v6 }
 0x1d5   : > { %v642_v9 = vpack.c.bf16 %v618_v13, %v616_v8  ;;  %v564_v20 = vpop.f32.mrb[16].mxu0  ;;  %1594 = vmatpush3.bf16.msra.mxu1 %v2489_v12  ;;  %v1783_v13 = vld [vmem:[#allocation11 + $0x70] sm:$0xff]  }
 0x1d6   : > { %v565_v21 = vadd.f32 %v564_v20, %v2499_v18  ;;  %v566_v22 = vpop.f32.mrb[17].mxu0  ;;  %1529 = vmatprep.subr.bf16.mxu0 %v1783_v13  ;;  %1587 = vmatprep.subr.bf16.mxu1 %v1783_v13 }
 0x1d7   : > { %v567_v23 = vadd.f32 %v566_v22, %v2503_v19  ;;  %v568_v24 = vpop.f32.mrb[18].mxu0  ;;  %917 = vmatprep.mubr.bf16.mxu1 %v642_v9  ;;  %v1785_v9 = vld [vmem:[#allocation11 + $0x78] sm:$0xff]  }
 0x1d8   : > { %v569_v10 = vadd.f32 %v568_v24, %v2499_v18  ;;  %v570_v25 = vpop.f32.mrb[19].mxu0  ;;  %918 = vmatmul.mubr.bf16.gmra.mrb[12].mxu1 %v641_v16  ;;  %v619_v26 = vmax.f32 %v565_v21, 0.0  ;;  %v1784_v16 = vld [vmem:[#allocation11 + $0x30] sm:$0xff]  }
 0x1d9   : > { %v571_v11 = vadd.f32 %v570_v25, %v2503_v19  ;;  %v620_v28 = vmax.f32 %v567_v23, 0.0  ;;  %1530 = vmatpush3.bf16.msra.mxu0 %v1784_v16  ;;  %1595 = vmatpush3.bf16.msra.mxu1 %v1784_v16 }
 0x1da   : > { %v621_v27 = vmax.f32 %v569_v10, 0.0  ;;  %1531 = vmatprep.subr.bf16.mxu0 %v1785_v9  ;;  %1588 = vmatprep.subr.bf16.mxu1 %v1785_v9 }
 0x1db   : > { %v622_v29 = vmax.f32 %v571_v11, 0.0 }
 0x1dc   : > { %v643_v30 = vpack.c.bf16 %v621_v27, %v619_v26 }
 0x1dd   : > { %v644_v31 = vpack.c.bf16 %v622_v29, %v620_v28  ;;  %v574_v12 = vpop.f32.mrb[20].mxu0 }
 0x1de   : > { %v575_v32 = vadd.f32 %v574_v12, %v2499_v18  ;;  %v576_v33 = vpop.f32.mrb[21].mxu0 }
 0x1df   : > { %v577_v34 = vadd.f32 %v576_v33, %v2503_v19  ;;  %v578_v35 = vpop.f32.mrb[22].mxu0  ;;  %927 = vmatprep.mubr.bf16.mxu1 %v644_v31 }
 0x1e0   : > { %v579_v36 = vadd.f32 %v578_v35, %v2499_v18  ;;  %v580_v37 = vpop.f32.mrb[23].mxu0  ;;  %928 = vmatmul.mubr.bf16.gmra.mrb[16].mxu1 %v643_v30  ;;  %v623_v39 = vmax.f32 %v575_v32, 0.0 }
 0x1e1   : > { %v581_v38 = vadd.f32 %v580_v37, %v2503_v19  ;;  %v624_v41 = vmax.f32 %v577_v34, 0.0 }
 0x1e2   : > { %v625_v40 = vmax.f32 %v579_v36, 0.0 }
 0x1e3   : > { %v626_v42 = vmax.f32 %v581_v38, 0.0 }
 0x1e4   : > { %v645_v43 = vpack.c.bf16 %v625_v40, %v623_v39 }
 0x1e5   : > { %v646_v44 = vpack.c.bf16 %v626_v42, %v624_v41  ;;  %v584_v45 = vpop.f32.mrb[24].mxu0 }
 0x1e6   : > { %v585_v46 = vadd.f32 %v584_v45, %v2499_v18  ;;  %v586_v47 = vpop.f32.mrb[25].mxu0 }
 0x1e7   : > { %v587_v48 = vadd.f32 %v586_v47, %v2503_v19  ;;  %v588_v49 = vpop.f32.mrb[26].mxu0  ;;  %937 = vmatprep.mubr.bf16.mxu1 %v646_v44 }
 0x1e8   : > { %v589_v50 = vadd.f32 %v588_v49, %v2499_v18  ;;  %v590_v51 = vpop.f32.mrb[27].mxu0  ;;  %938 = vmatmul.mubr.bf16.gmra.mrb[20].mxu1 %v645_v43  ;;  %v627_v53 = vmax.f32 %v585_v46, 0.0 }
 0x1e9   : > { %v591_v52 = vadd.f32 %v590_v51, %v2503_v19  ;;  %v628_v55 = vmax.f32 %v587_v48, 0.0 }
 0x1ea   : > { %v629_v54 = vmax.f32 %v589_v50, 0.0 }
 0x1eb   : > { %v630_v56 = vmax.f32 %v591_v52, 0.0 }
 0x1ec   : > { %v647_v57 = vpack.c.bf16 %v629_v54, %v627_v53 }
 0x1ed   : > { %v648_v58 = vpack.c.bf16 %v630_v56, %v628_v55  ;;  %v594_v59 = vpop.f32.mrb[28].mxu0 }
 0x1ee   : > { %v595_v60 = vadd.f32 %v594_v59, %v2499_v18  ;;  %v596_v61 = vpop.f32.mrb[29].mxu0 }
 0x1ef   : > { %v597_v62 = vadd.f32 %v596_v61, %v2503_v19  ;;  %v598_v63 = vpop.f32.mrb[30].mxu0  ;;  %947 = vmatprep.mubr.bf16.mxu1 %v648_v58 }
 0x1f0   : > { %v599_v1 = vadd.f32 %v598_v63, %v2499_v18  ;;  %v600_v2 = vpop.f32.mrb[31].mxu0  ;;  %948 = vmatmul.mubr.bf16.gmra.mrb[24].mxu1 %v647_v57  ;;  %v631_v4 = vmax.f32 %v595_v60, 0.0  ;;  %v1786_v18 = vld [vmem:[#allocation11 + $0x38] sm:$0xff]  }
 0x1f1   : > { %v601_v3 = vadd.f32 %v600_v2, %v2503_v19  ;;  %v632_v5 = vmax.f32 %v597_v62, 0.0  ;;  %1532 = vmatpush3.bf16.msra.mxu0 %v1786_v18  ;;  %1596 = vmatpush3.bf16.msra.mxu1 %v1786_v18  ;;  %v683_v19 = vld [vmem:[#allocation10] sm:$0x3] }
 0x1f2   : > { %v633_v0 = vmax.f32 %v599_v1, 0.0  ;;  %v2546_v20 = vrot.slane %v683_v19, %v417_v15  ;;  %v2550_v21 = vrot.slane %v683_v19, %v421_v17 }
 0x1f3   : > { %v634_v6 = vmax.f32 %v601_v3, 0.0 }
 0x1f4   : > { %v649_v7 = vpack.c.bf16 %v633_v0, %v631_v4 }
 0x1f5   : > { %v650_v8 = vpack.c.bf16 %v634_v6, %v632_v5 }
 0x1f7   : > { %957 = vmatprep.mubr.bf16.mxu1 %v650_v8 }
 0x1f8   : > { %958 = vmatmul.mubr.bf16.gmra.mrb[28].mxu1 %v649_v7 }
 0x293   : > { %v889_v22 = vpop.f32.mrb[0].mxu1 }
 0x294   : > { %v890_v23 = vadd.f32 %v889_v22, %v2546_v20  ;;  %v891_v24 = vpop.f32.mrb[1].mxu1 }
 0x295   : > { %v892_v10 = vadd.f32 %v891_v24, %v2550_v21  ;;  %v893_v25 = vpop.f32.mrb[2].mxu1 }
 0x296   : > { %v894_v11 = vadd.f32 %v893_v25, %v2546_v20  ;;  %v895_v26 = vpop.f32.mrb[3].mxu1  ;;  %v968_v28 = vmax.f32 %v890_v23, 0.0 }
 0x297   : > { %v896_v27 = vadd.f32 %v895_v26, %v2550_v21  ;;  %v969_v15 = vmax.f32 %v892_v10, 0.0 }
 0x298   : > { %v970_v29 = vmax.f32 %v894_v11, 0.0 }
 0x299   : > { %v971_v30 = vmax.f32 %v896_v27, 0.0 }
 0x29a   : > { %v1000_v31 = vpack.c.bf16 %v970_v29, %v968_v28 }
 0x29b   : > { %v1001_v14 = vpack.c.bf16 %v971_v30, %v969_v15  ;;  %v899_v17 = vpop.f32.mrb[4].mxu1 }
 0x29c   : > { %v900_v12 = vadd.f32 %v899_v17, %v2546_v20  ;;  %v901_v32 = vpop.f32.mrb[5].mxu1 }
 0x29d   : > { %v902_v33 = vadd.f32 %v901_v32, %v2550_v21  ;;  %v903_v34 = vpop.f32.mrb[6].mxu1  ;;  %1183 = vmatprep.mubr.bf16.mxu0 %v1001_v14 }
 0x29e   : > { %v904_v35 = vadd.f32 %v903_v34, %v2546_v20  ;;  %v905_v36 = vpop.f32.mrb[7].mxu1  ;;  %1184 = vmatmul.mubr.bf16.vlgmr.msra.gmra.mrb[32].mxu0 %v1000_v31  ;;  %v972_v38 = vmax.f32 %v900_v12, 0.0 }
 0x29f   : > { %v906_v37 = vadd.f32 %v905_v36, %v2550_v21  ;;  %v973_v40 = vmax.f32 %v902_v33, 0.0 }
 0x2a0   : > { %v974_v39 = vmax.f32 %v904_v35, 0.0 }
 0x2a1   : > { %v975_v41 = vmax.f32 %v906_v37, 0.0 }
 0x2a2   : > { %v1002_v42 = vpack.c.bf16 %v974_v39, %v972_v38 }
 0x2a3   : > { %v1003_v43 = vpack.c.bf16 %v975_v41, %v973_v40  ;;  %v909_v44 = vpop.f32.mrb[8].mxu1 }
 0x2a4   : > { %v910_v45 = vadd.f32 %v909_v44, %v2546_v20  ;;  %v911_v46 = vpop.f32.mrb[9].mxu1 }
 0x2a5   : > { %v912_v47 = vadd.f32 %v911_v46, %v2550_v21  ;;  %v913_v48 = vpop.f32.mrb[10].mxu1  ;;  %1191 = vmatprep.mubr.bf16.mxu0 %v1003_v43 }
 0x2a6   : > { %v914_v49 = vadd.f32 %v913_v48, %v2546_v20  ;;  %v915_v50 = vpop.f32.mrb[11].mxu1  ;;  %1192 = vmatmul.mubr.bf16.gmra.mrb[36].mxu0 %v1002_v42  ;;  %v976_v52 = vmax.f32 %v910_v45, 0.0 }
 0x2a7   : > { %v916_v51 = vadd.f32 %v915_v50, %v2550_v21  ;;  %v977_v54 = vmax.f32 %v912_v47, 0.0 }
 0x2a8   : > { %v978_v53 = vmax.f32 %v914_v49, 0.0 }
 0x2a9   : > { %v979_v55 = vmax.f32 %v916_v51, 0.0 }
 0x2aa   : > { %v1004_v56 = vpack.c.bf16 %v978_v53, %v976_v52 }
 0x2ab   : > { %v1005_v57 = vpack.c.bf16 %v979_v55, %v977_v54  ;;  %v919_v58 = vpop.f32.mrb[12].mxu1 }
 0x2ac   : > { %v920_v59 = vadd.f32 %v919_v58, %v2546_v20  ;;  %v921_v60 = vpop.f32.mrb[13].mxu1 }
 0x2ad   : > { %v922_v61 = vadd.f32 %v921_v60, %v2550_v21  ;;  %v923_v62 = vpop.f32.mrb[14].mxu1  ;;  %1199 = vmatprep.mubr.bf16.mxu0 %v1005_v57 }
 0x2ae   : > { %v924_v63 = vadd.f32 %v923_v62, %v2546_v20  ;;  %v925_v1 = vpop.f32.mrb[15].mxu1  ;;  %1200 = vmatmul.mubr.bf16.gmra.mrb[40].mxu0 %v1004_v56  ;;  %v980_v3 = vmax.f32 %v920_v59, 0.0 }
 0x2af   : > { %v926_v2 = vadd.f32 %v925_v1, %v2550_v21  ;;  %v981_v0 = vmax.f32 %v922_v61, 0.0 }
 0x2b0   : > { %v982_v4 = vmax.f32 %v924_v63, 0.0 }
 0x2b1   : > { %v983_v5 = vmax.f32 %v926_v2, 0.0 }
 0x2b2   : > { %v1006_v6 = vpack.c.bf16 %v982_v4, %v980_v3  ;;  %v2584_v4 = vld [vmem:[#allocation13] ss:$0 sm:$0xff] }
 0x2b3   : > { %v1007_v7 = vpack.c.bf16 %v983_v5, %v981_v0  ;;  %v929_v8 = vpop.f32.mrb[16].mxu1 }
 0x2b4   : > { %v930_v13 = vadd.f32 %v929_v8, %v2546_v20  ;;  %v931_v16 = vpop.f32.mrb[17].mxu1 }
 0x2b5   : > { %v932_v9 = vadd.f32 %v931_v16, %v2550_v21  ;;  %v933_v18 = vpop.f32.mrb[18].mxu1  ;;  %1207 = vmatprep.mubr.bf16.mxu0 %v1007_v7 }
 0x2b6   : > { %v934_v19 = vadd.f32 %v933_v18, %v2546_v20  ;;  %v935_v22 = vpop.f32.mrb[19].mxu1  ;;  %1208 = vmatmul.mubr.bf16.gmra.mrb[44].mxu0 %v1006_v6  ;;  %v984_v24 = vmax.f32 %v930_v13, 0.0 }
 0x2b7   : > { %v936_v23 = vadd.f32 %v935_v22, %v2550_v21  ;;  %v985_v25 = vmax.f32 %v932_v9, 0.0 }
 0x2b8   : > { %v986_v10 = vmax.f32 %v934_v19, 0.0 }
 0x2b9   : > { %v987_v11 = vmax.f32 %v936_v23, 0.0 }
 0x2ba   : > { %v1008_v26 = vpack.c.bf16 %v986_v10, %v984_v24 }
 0x2bb   : > { %v1009_v27 = vpack.c.bf16 %v987_v11, %v985_v25  ;;  %v939_v28 = vpop.f32.mrb[20].mxu1 }
 0x2bc   : > { %v940_v29 = vadd.f32 %v939_v28, %v2546_v20  ;;  %v941_v15 = vpop.f32.mrb[21].mxu1 }
 0x2bd   : > { %v942_v30 = vadd.f32 %v941_v15, %v2550_v21  ;;  %v943_v31 = vpop.f32.mrb[22].mxu1  ;;  %1215 = vmatprep.mubr.bf16.mxu0 %v1009_v27 }
 0x2be   : > { %v944_v14 = vadd.f32 %v943_v31, %v2546_v20  ;;  %v945_v17 = vpop.f32.mrb[23].mxu1  ;;  %1216 = vmatmul.mubr.bf16.gmra.mrb[48].mxu0 %v1008_v26  ;;  %v988_v32 = vmax.f32 %v940_v29, 0.0 }
 0x2bf   : > { %v946_v12 = vadd.f32 %v945_v17, %v2550_v21  ;;  %v989_v34 = vmax.f32 %v942_v30, 0.0 }
 0x2c0   : > { %v990_v33 = vmax.f32 %v944_v14, 0.0 }
 0x2c1   : > { %v991_v35 = vmax.f32 %v946_v12, 0.0 }
 0x2c2   : > { %v1010_v36 = vpack.c.bf16 %v990_v33, %v988_v32 }
 0x2c3   : > { %v1011_v37 = vpack.c.bf16 %v991_v35, %v989_v34  ;;  %v949_v38 = vpop.f32.mrb[24].mxu1 }
 0x2c4   : > { %v950_v39 = vadd.f32 %v949_v38, %v2546_v20  ;;  %v951_v40 = vpop.f32.mrb[25].mxu1 }
 0x2c5   : > { %v952_v41 = vadd.f32 %v951_v40, %v2550_v21  ;;  %v953_v42 = vpop.f32.mrb[26].mxu1  ;;  %1223 = vmatprep.mubr.bf16.mxu0 %v1011_v37 }
 0x2c6   : > { %v954_v43 = vadd.f32 %v953_v42, %v2546_v20  ;;  %v955_v44 = vpop.f32.mrb[27].mxu1  ;;  %1224 = vmatmul.mubr.bf16.gmra.mrb[52].mxu0 %v1010_v36  ;;  %v992_v46 = vmax.f32 %v950_v39, 0.0 }
 0x2c7   : > { %v956_v45 = vadd.f32 %v955_v44, %v2550_v21  ;;  %v993_v48 = vmax.f32 %v952_v41, 0.0 }
 0x2c8   : > { %v994_v47 = vmax.f32 %v954_v43, 0.0 }
 0x2c9   : > { %v995_v49 = vmax.f32 %v956_v45, 0.0 }
 0x2ca   : > { %v1012_v50 = vpack.c.bf16 %v994_v47, %v992_v46 }
 0x2cb   : > { %v1013_v51 = vpack.c.bf16 %v995_v49, %v993_v48  ;;  %v959_v52 = vpop.f32.mrb[28].mxu1 }
 0x2cc   : > { %v960_v53 = vadd.f32 %v959_v52, %v2546_v20  ;;  %v961_v54 = vpop.f32.mrb[29].mxu1 }
 0x2cd   : > { %v962_v55 = vadd.f32 %v961_v54, %v2550_v21  ;;  %v963_v56 = vpop.f32.mrb[30].mxu1  ;;  %1231 = vmatprep.mubr.bf16.mxu0 %v1013_v51 }
 0x2ce   : > { %v964_v57 = vadd.f32 %v963_v56, %v2546_v20  ;;  %v965_v58 = vpop.f32.mrb[31].mxu1  ;;  %1232 = vmatmul.mubr.bf16.gmra.mrb[56].mxu0 %v1012_v50  ;;  %v996_v60 = vmax.f32 %v960_v53, 0.0 }
 0x2cf   : > { %v966_v59 = vadd.f32 %v965_v58, %v2550_v21  ;;  %v997_v62 = vmax.f32 %v962_v55, 0.0 }
 0x2d0   : > { %v998_v61 = vmax.f32 %v964_v57, 0.0 }
 0x2d1   : > { %v999_v63 = vmax.f32 %v966_v59, 0.0 }
 0x2d2   : > { %v1014_v1 = vpack.c.bf16 %v998_v61, %v996_v60 }
 0x2d3   : > { %v1015_v2 = vpack.c.bf16 %v999_v63, %v997_v62 }
 0x2d5   : > { %1239 = vmatprep.mubr.bf16.mxu1 %v1015_v2 }
 0x2d6   : > { %1240 = vmatmul.mubr.bf16.vlgmr.msra.gmra.mrb[32].mxu1 %v1014_v1 }
 0x371   : > { %v1533_v3 = vpop.f32.mrb[32].mxu0 }
 0x372   : > { %v1534_v0 = vpop.f32.mrb[33].mxu0 }
 0x373   : > { %v1535_v5 = vadd.f32 %v1534_v0, %v1533_v3  ;;  %v1536_v6 = vpop.f32.mrb[34].mxu0 }
 0x374   : > { %v1537_v7 = vpop.f32.mrb[35].mxu0 }
 0x375   : > { %v1186_v20 = vadd.f32 %v1535_v5, %v2584_v4  ;;  %v1538_v8 = vadd.f32 %v1537_v7, %v1536_v6 }
 0x377   : > { %1787 = vtanh.f32 %v1186_v20  ;;  %v1189_v21 = vadd.f32 %v1538_v8, %v2584_v4 }
 0x379   : > { %1789 = vtanh.f32 %v1189_v21  ;;  %v1539_v13 = vpop.f32.mrb[36].mxu0 }
 0x37a   : > { %v1540_v16 = vpop.f32.mrb[37].mxu0 }
 0x37b   : > { %v1541_v9 = vadd.f32 %v1540_v16, %v1539_v13  ;;  %v1542_v18 = vpop.f32.mrb[38].mxu0 }
 0x37c   : > { %v1543_v19 = vpop.f32.mrb[39].mxu0 }
 0x37d   : > { %v1194_v22 = vadd.f32 %v1541_v9, %v2584_v4  ;;  %v1544_v23 = vadd.f32 %v1543_v19, %v1542_v18 }
 0x37f   : > { %1791 = vtanh.f32 %v1194_v22  ;;  %v1197_v24 = vadd.f32 %v1544_v23, %v2584_v4 }
 0x381   : > { %v1788_v10 = vpop.eup %1787  ;;  %1793 = vtanh.f32 %v1197_v24  ;;  %v1545_v25 = vpop.f32.mrb[40].mxu0 }
 0x382   : > { %1264 = vst [vmem:[%s2592_s8] sm:$0xff] %v1788_v10  ;;  %v1546_v11 = vpop.f32.mrb[41].mxu0 }
 0x383   : > { %v1790_v26 = vpop.eup %1789  ;;  %v1547_v27 = vadd.f32 %v1546_v11, %v1545_v25  ;;  %v1548_v28 = vpop.f32.mrb[42].mxu0 }
 0x384   : > { %1265 = vst [vmem:[%s2592_s8 + $0x8] sm:$0xff] %v1790_v26  ;;  %v1549_v29 = vpop.f32.mrb[43].mxu0 }
 0x385   : > { %v1202_v15 = vadd.f32 %v1547_v27, %v2584_v4  ;;  %v1550_v30 = vadd.f32 %v1549_v29, %v1548_v28 }
 0x387   : > { %1795 = vtanh.f32 %v1202_v15  ;;  %v1205_v31 = vadd.f32 %v1550_v30, %v2584_v4 }
 0x389   : > { %v1792_v14 = vpop.eup %1791  ;;  %1797 = vtanh.f32 %v1205_v31  ;;  %v1551_v17 = vpop.f32.mrb[44].mxu0 }
 0x38a   : > { %1266 = vst [vmem:[%s2592_s8 + $0x10] sm:$0xff] %v1792_v14  ;;  %v1552_v12 = vpop.f32.mrb[45].mxu0 }
 0x38b   : > { %v1794_v32 = vpop.eup %1793  ;;  %v1553_v33 = vadd.f32 %v1552_v12, %v1551_v17  ;;  %v1554_v34 = vpop.f32.mrb[46].mxu0 }
 0x38c   : > { %1267 = vst [vmem:[%s2592_s8 + $0x18] sm:$0xff] %v1794_v32  ;;  %v1555_v35 = vpop.f32.mrb[47].mxu0 }
 0x38d   : > { %v1210_v36 = vadd.f32 %v1553_v33, %v2584_v4  ;;  %v1556_v37 = vadd.f32 %v1555_v35, %v1554_v34 }
 0x38f   : > { %1799 = vtanh.f32 %v1210_v36  ;;  %v1213_v38 = vadd.f32 %v1556_v37, %v2584_v4 }
 0x391   : > { %v1796_v39 = vpop.eup %1795  ;;  %1801 = vtanh.f32 %v1213_v38  ;;  %v1557_v40 = vpop.f32.mrb[48].mxu0 }
 0x392   : > { %1268 = vst [vmem:[%s2592_s8 + $0x20] sm:$0xff] %v1796_v39  ;;  %v1558_v41 = vpop.f32.mrb[49].mxu0 }
 0x393   : > { %v1798_v42 = vpop.eup %1797  ;;  %v1559_v43 = vadd.f32 %v1558_v41, %v1557_v40  ;;  %v1560_v44 = vpop.f32.mrb[50].mxu0 }
 0x394   : > { %1269 = vst [vmem:[%s2592_s8 + $0x28] sm:$0xff] %v1798_v42  ;;  %v1561_v45 = vpop.f32.mrb[51].mxu0 }
 0x395   : > { %v1218_v46 = vadd.f32 %v1559_v43, %v2584_v4  ;;  %v1562_v47 = vadd.f32 %v1561_v45, %v1560_v44 }
 0x397   : > { %1803 = vtanh.f32 %v1218_v46  ;;  %v1221_v48 = vadd.f32 %v1562_v47, %v2584_v4 }
 0x399   : > { %v1800_v49 = vpop.eup %1799  ;;  %1805 = vtanh.f32 %v1221_v48  ;;  %v1563_v50 = vpop.f32.mrb[52].mxu0 }
 0x39a   : > { %1270 = vst [vmem:[%s2592_s8 + $0x30] sm:$0xff] %v1800_v49  ;;  %v1564_v51 = vpop.f32.mrb[53].mxu0 }
 0x39b   : > { %v1802_v52 = vpop.eup %1801  ;;  %v1565_v53 = vadd.f32 %v1564_v51, %v1563_v50  ;;  %v1566_v54 = vpop.f32.mrb[54].mxu0 }
 0x39c   : > { %1271 = vst [vmem:[%s2592_s8 + $0x38] sm:$0xff] %v1802_v52  ;;  %v1567_v55 = vpop.f32.mrb[55].mxu0 }
 0x39d   : > { %v1226_v56 = vadd.f32 %v1565_v53, %v2584_v4  ;;  %v1568_v57 = vadd.f32 %v1567_v55, %v1566_v54 }
 0x39f   : > { %1807 = vtanh.f32 %v1226_v56  ;;  %v1229_v58 = vadd.f32 %v1568_v57, %v2584_v4 }
 0x3a1   : > { %v1804_v59 = vpop.eup %1803  ;;  %1809 = vtanh.f32 %v1229_v58  ;;  %v1569_v60 = vpop.f32.mrb[56].mxu0 }
 0x3a2   : > { %1272 = vst [vmem:[%s2592_s8 + $0x40] sm:$0xff] %v1804_v59  ;;  %v1570_v61 = vpop.f32.mrb[57].mxu0 }
 0x3a3   : > { %v1806_v62 = vpop.eup %1805  ;;  %v1571_v63 = vadd.f32 %v1570_v61, %v1569_v60  ;;  %v1572_v1 = vpop.f32.mrb[58].mxu0 }
 0x3a4   : > { %1273 = vst [vmem:[%s2592_s8 + $0x48] sm:$0xff] %v1806_v62  ;;  %v1573_v2 = vpop.f32.mrb[59].mxu0 }
 0x3a5   : > { %v1234_v3 = vadd.f32 %v1571_v63, %v2584_v4  ;;  %v1574_v0 = vadd.f32 %v1573_v2, %v1572_v1 }
 0x3a7   : > { %1811 = vtanh.f32 %v1234_v3  ;;  %v1237_v5 = vadd.f32 %v1574_v0, %v2584_v4 }
 0x3a9   : > { %v1808_v6 = vpop.eup %1807  ;;  %1813 = vtanh.f32 %v1237_v5  ;;  %v1575_v7 = vpop.f32.mrb[32].mxu1 }
 0x3aa   : > { %1274 = vst [vmem:[%s2592_s8 + $0x50] sm:$0xff] %v1808_v6  ;;  %v1576_v20 = vpop.f32.mrb[33].mxu1 }
 0x3ab   : > { %v1810_v8 = vpop.eup %1809  ;;  %v1577_v21 = vadd.f32 %v1576_v20, %v1575_v7  ;;  %v1578_v13 = vpop.f32.mrb[34].mxu1 }
 0x3ac   : > { %1275 = vst [vmem:[%s2592_s8 + $0x58] sm:$0xff] %v1810_v8  ;;  %v1579_v16 = vpop.f32.mrb[35].mxu1 }
 0x3ad   : > { %v1242_v9 = vadd.f32 %v1577_v21, %v2584_v4  ;;  %v1580_v18 = vadd.f32 %v1579_v16, %v1578_v13 }
 0x3af   : > { %1815 = vtanh.f32 %v1242_v9  ;;  %v1245_v19 = vadd.f32 %v1580_v18, %v2584_v4 }
 0x3b1   : > { %v1812_v22 = vpop.eup %1811  ;;  %1817 = vtanh.f32 %v1245_v19 }
 0x3b2   : > { %1276 = vst [vmem:[%s2592_s8 + $0x60] sm:$0xff] %v1812_v22 }
 0x3b3   : > { %v1814_v23 = vpop.eup %1813 }
 0x3b4   : > { %1277 = vst [vmem:[%s2592_s8 + $0x68] sm:$0xff] %v1814_v23 }
 0x3b9   : > { %v1816_v24 = vpop.eup %1815 }
 0x3ba   : > { %1278 = vst [vmem:[%s2592_s8 + $0x70] sm:$0xff] %v1816_v24 }
 0x3bb   : > { %v1818_v4 = vpop.eup %1817 }
 0x3bc   : > { %1279 = vst [vmem:[%s2592_s8 + $0x78] sm:$0xff] %v1818_v4 }
 0x3bd   : > { %2030 = shalt.err (!%p2027_p8)
}
 0x3be   : > { %s2031_s1 = scalar_lea.hbm %s2625_s13, 2048  ;;  %s2035_s15 = scalar_lea.hbm %s2680_s7, 4096 }
 0x3bf   : > { %p2032_p4 = scmp.ne.s32.totalorder %s2625_s13, %s2031_s1  ;;  %p2036_p0 = scmp.lt.u32.totalorder %s2625_s13, %s2680_s7 }
 0x3c0   : > { %p2037_p5 = scmp.lt.u32.totalorder %s2035_s15, %s2031_s1  ;;  %p2039_p6 = scmp.lt.u32.totalorder %s2031_s1, %s2625_s13 }
 0x3c1   : > { %p2033_p10 = pnand %p2032_p4, %p2706_p9 }
 0x3c2   : > { %p2038_p7 = por %p2037_p5, %p2036_p0 }
 0x3c3   : > { %p2034_p11 = pneg %p2033_p10 }
 0x3c4   : > { %p2040_p12 = por %p2039_p6, %p2038_p7 }
 0x3c6   : > { %p2041_p13 = pnand %p2040_p12, %p2034_p11 }
 0x3c8   : > { %2044 = shalt.err (!%p2041_p13)
}
 0x3c9   : > { %s2110_s12 = smov 128   ;;  %s2111_s19 = smov 8  }
 0x3ca   : > { %1623 = dma.vmem_to_hbm [thread:$0]  (%p2706_p9), %s2627_s16, 2048, %s2625_s13, %s1281_s22, %s2110_s12, %s2110_s12, %s2111_s19  }
 0x3cb PF: > { %s1309_s9 = sand.u32 1, %s2083_s24   ;;  %p2707_p1 = scmp.ne.s32.totalorder %s2695_s21, 0 }
 0x3cc   : > { %p2708_p3 = scmp.ge.s32.totalorder %s2095_s27, 2  ;;  %s1310_s30 = scalar_lea.sflag [#allocation4], %s1309_s9 }
 0x3ce   : > { %p1649_p2 = pnand %p2708_p3, %p2707_p1 }
 0x3d0   : > { %2078 = dma.done.wait (!%p1649_p2), %s1310_s30, 2048  }
 0x3d1   : > { %2080 = vsyncadd (!%p1649_p2), %s1310_s30, 4294965248  ;;  %p23_p8 = scmp.ge.s32.totalorder %s2334_s11, 4   ;;  %s2709_s24 = smov %s2087_s25 }
 0x3d2   : > { %s2710_s25 = smov %s2091_s26  ;;  %s2711_s26 = smov %s2345_s18 }
 0x3d3   : > { %s2712_s27 = smov %s2334_s11  ;;  %25 = sbr.rel (!%p23_p8) target bundleno = 10 (0xa), region = 117 }
 0x3da   :  { %1315 = vsyncpa [#allocation3], 1 }
 0x3db   :  { %1317 = vsyncpa [#allocation3 + $0x1], 1 }
 0x3dc   :  { %1318 = vsyncpa [#allocation6], 1 }
 0x3dd   :  { %1319 = vsyncpa [#allocation9], 1 }
 0x3de   :  { %1320 = vsyncpa [#allocation12], 1 }
 0x3df   :  { %1321 = vsyncpa [#allocation4], 1 }
 0x3e0   :  { %1323 = vsyncpa [#allocation4 + $0x1], 1 }

</bundles_post_ra>
